<compile_context>
chip_gen: v7x
topology: tpu7x:2x2x1
jax: 0.10.0
libtpu: 0.0.40
codegen_flags: <defaults>
</compile_context>

<pallas_src>
import math

import jax
import jax.numpy as jnp
from jax.experimental import pallas as pl
from jax.experimental.pallas import tpu as pltpu


def _fused_mlp_kernel(x_ref, wt_ref, b_ref, out_ref, mom_ref):
    """Whole network in one grid step.

    x_ref   : (B, N)    f32   network input
    wt_ref  : (L, N, N) bf16  stacked W^T (PyTorch Linear: y = x @ W^T + b)
    b_ref   : (L, N)    f32   stacked biases
    out_ref : (B, N)    f32   final activation
    mom_ref : (L, 2, N) f32   per-layer batch-reduced [sum, sum-of-squares]
    """
    num_layers = wt_ref.shape[0]
    h = x_ref[...]                                   # f32 activation, stays on-chip
    for layer in range(num_layers):                  # static trip count -> fully unrolled
        # MXU matmul in bf16 with f32 accumulation.
        y = jnp.dot(h.astype(wt_ref.dtype), wt_ref[layer],
                    preferred_element_type=jnp.float32)
        # Bias + ReLU epilogue in f32.
        y = jnp.maximum(y + b_ref[layer:layer + 1, :], 0.0)
        # Batch (sublane) reduction here; lane reduction is finished in the
        # wrapper -- avoids writing the full (L, B, N) activation to HBM.
        mom_ref[layer, 0:1, :] = jnp.sum(y, axis=0, keepdims=True)
        mom_ref[layer, 1:2, :] = jnp.sum(y * y, axis=0, keepdims=True)
        h = y
    out_ref[...] = h


@jax.jit
def fused_mlp_forward(x, weights_t, biases):
    """Run all layers in one pallas_call; return (final activation, per-layer std)."""
    num_layers, n, _ = weights_t.shape
    batch = x.shape[0]

    out, moments = pl.pallas_call(
        _fused_mlp_kernel,
        out_shape=(
            jax.ShapeDtypeStruct((batch, n), jnp.float32),
            jax.ShapeDtypeStruct((num_layers, 2, n), jnp.float32),
        ),
        grid=(1,),
        in_specs=[
            pl.BlockSpec((batch, n), lambda i: (0, 0)),               # x
            pl.BlockSpec((num_layers, n, n), lambda i: (0, 0, 0)),    # stacked W^T
            pl.BlockSpec((num_layers, n), lambda i: (0, 0)),          # stacked bias
        ],
        out_specs=(
            pl.BlockSpec((batch, n), lambda i: (0, 0)),               # final act
            pl.BlockSpec((num_layers, 2, n), lambda i: (0, 0, 0)),    # moments
        ),
        compiler_params=pltpu.CompilerParams(
            dimension_semantics=("arbitrary",),
            vmem_limit_bytes=32 * 1024 * 1024,
        ),
    )(x, weights_t, biases)

    # Finish the moment reduction over the lane axis and form the unbiased std
    # (matches torch.Tensor.std(), ddof=1 over all B*N elements).
    count = batch * n
    s1 = jnp.sum(moments[:, 0, :], axis=-1)
    s2 = jnp.sum(moments[:, 1, :], axis=-1)
    var = (s2 - s1 * s1 / count) / (count - 1)
    stds = jnp.sqrt(jnp.maximum(var, 0.0))
    return out, stds


class MLP:
    """JAX/Pallas port of the PyTorch MLP (stack of Linear(N, N) + ReLU)."""

    def __init__(self, neural_num, layer_num, key):
        self.neural_num = neural_num
        self.layer_num = layer_num
        # initialize(): kaiming_normal_ (fan_in mode, gain=sqrt(2)), zero bias.
        std = (2.0 / neural_num) ** 0.5
        keys = jax.random.split(key, layer_num)
        # Generate W^T directly as (in, out); for iid normal entries this has
        # the same distribution as transposing the PyTorch (out, in) weight.
        w_t = jnp.stack(
            [jax.random.normal(k, (neural_num, neural_num), dtype=jnp.float32) * std
             for k in keys]
        )
        # bf16 weights: halved HBM traffic + fast MXU path; f32 accumulation
        # is preserved inside the kernel.
        self.weights_t = w_t.astype(jnp.bfloat16)
        self.biases = jnp.zeros((layer_num, neural_num), dtype=jnp.float32)

    def forward(self, x):
        out, stds = fused_mlp_forward(x, self.weights_t, self.biases)
        stds = jax.device_get(stds)  # ONE host sync for the whole forward
        for i in range(self.layer_num):
            s = float(stds[i])
            print('layer:{}, std:{}'.format(i, s))
            if math.isnan(s):
                # TODO(synk): the PyTorch module stops the forward at the first
                # NaN layer; the fused kernel always runs all layers, so here a
                # NaN only stops the printing (never triggered with this init).
                break
        return out


def _reference_forward(x, weights_t_bf16, biases):
    """Pure-JAX reference with the same dtype recipe (sanity check only)."""
    h = x
    stds = []
    for i in range(weights_t_bf16.shape[0]):
        y = jnp.dot(h.astype(jnp.bfloat16), weights_t_bf16[i],
                    preferred_element_type=jnp.float32)
        h = jnp.maximum(y + biases[i][None, :], 0.0)
        stds.append(jnp.std(h, ddof=1))
    return h, jnp.stack(stds)


if __name__ == "__main__":
    neural_num = 128
    layer_num = 4
    batch = 8

    key = jax.random.PRNGKey(0)
    k_param, k_x = jax.random.split(key)

    model = MLP(neural_num, layer_num, k_param)
    x = jax.random.normal(k_x, (batch, neural_num), dtype=jnp.float32)

    out = model.forward(x)
    jax.block_until_ready(out)

    ref_out, ref_stds = _reference_forward(x, model.weights_t, model.biases)
    assert jnp.allclose(out, ref_out, rtol=1e-2, atol=1e-2), "output mismatch vs. reference"

    _, stds = fused_mlp_forward(x, model.weights_t, model.biases)
    assert jnp.allclose(stds, ref_stds, rtol=1e-2, atol=1e-3), "std mismatch vs. reference"

    print("KERNEL_OK")
</pallas_src>

<mosaic_0001>
module attributes {stable_mosaic.version = 11 : i64} {
  func.func @_fused_mlp_kernel(%arg0: i32, %arg1: memref<8x128xf32, #tpu.memory_space<vmem>>, %arg2: memref<4x128x128xbf16, #tpu.memory_space<vmem>>, %arg3: memref<4x128xf32, #tpu.memory_space<vmem>>, %arg4: memref<8x128xf32, #tpu.memory_space<vmem>>, %arg5: memref<4x2x128xf32, #tpu.memory_space<vmem>>) attributes {dimension_semantics = [#tpu.dimension_semantics<arbitrary>], iteration_bounds = array<i64: 1>, scalar_prefetch = 0 : i64, scratch_operands = 0 : i64, tpu.core_type = #tpu.core_type<tc>, window_params = [{pipeline_mode = #tpu.pipeline_mode<synchronous>, transform_indices = @transform_0, window_bounds = array<i64: 8, 128>}, {pipeline_mode = #tpu.pipeline_mode<synchronous>, transform_indices = @transform_1, window_bounds = array<i64: 4, 128, 128>}, {pipeline_mode = #tpu.pipeline_mode<synchronous>, transform_indices = @transform_2, window_bounds = array<i64: 4, 128>}, {pipeline_mode = #tpu.pipeline_mode<synchronous>, transform_indices = @transform_3, window_bounds = array<i64: 8, 128>}, {pipeline_mode = #tpu.pipeline_mode<synchronous>, transform_indices = @transform_4, window_bounds = array<i64: 4, 2, 128>}]} {
    %c0 = arith.constant 0 : index
    %c0_0 = arith.constant 0 : index
    %0 = vector.load %arg1[%c0, %c0_0] : memref<8x128xf32, #tpu.memory_space<vmem>>, vector<8x128xf32>
    %1 = arith.truncf %0 : vector<8x128xf32> to vector<8x128xbf16>
    %c0_1 = arith.constant 0 : index
    %c0_2 = arith.constant 0 : index
    %c0_3 = arith.constant 0 : index
    %2 = vector.load %arg2[%c0_1, %c0_2, %c0_3] : memref<4x128x128xbf16, #tpu.memory_space<vmem>>, vector<1x128x128xbf16>
    %3 = vector.shape_cast %2 : vector<1x128x128xbf16> to vector<128x128xbf16>
    %cst = arith.constant dense<0.000000e+00> : vector<8x128xf32>
    %4 = tpu.matmul %1, %3, %cst {dimension_numbers = #tpu.dot_dimension_numbers<[1], [0], [0], [1], [0, 0, 1, 1], [], []>} : vector<8x128xbf16>, vector<128x128xbf16>, vector<8x128xf32> -> vector<8x128xf32>
    %c0_4 = arith.constant 0 : index
    %c0_5 = arith.constant 0 : index
    %5 = vector.load %arg3[%c0_4, %c0_5] : memref<4x128xf32, #tpu.memory_space<vmem>>, vector<1x128xf32>
    %6 = vector.broadcast %5 : vector<1x128xf32> to vector<8x128xf32>
    %7 = arith.addf %4, %6 : vector<8x128xf32>
    %cst_6 = arith.constant 0.000000e+00 : f32
    %8 = vector.broadcast %cst_6 : f32 to vector<8x128xf32>
    %9 = arith.maximumf %7, %8 : vector<8x128xf32>
    %cst_7 = arith.constant dense<0.000000e+00> : vector<128xf32>
    %10 = vector.multi_reduction <add>, %9, %cst_7 [0] : vector<8x128xf32> to vector<128xf32>
    %11 = vector.shape_cast %10 : vector<128xf32> to vector<1x128xf32>
    %c0_8 = arith.constant 0 : index
    %c0_9 = arith.constant 0 : index
    %c0_10 = arith.constant 0 : index
    %12 = vector.load %arg5[%c0_8, %c0_9, %c0_10] : memref<4x2x128xf32, #tpu.memory_space<vmem>>, vector<1x1x128xf32>
    %13 = vector.shape_cast %12 : vector<1x1x128xf32> to vector<1x128xf32>
    %14 = vector.shape_cast %11 : vector<1x128xf32> to vector<1x1x128xf32>
    tpu.vector_store %arg5[%c0_8, %c0_9, %c0_10], %14 {strides = array<i32>} : memref<4x2x128xf32, #tpu.memory_space<vmem>>, vector<1x1x128xf32>,
    %15 = arith.mulf %9, %9 : vector<8x128xf32>
    %cst_11 = arith.constant dense<0.000000e+00> : vector<128xf32>
    %16 = vector.multi_reduction <add>, %15, %cst_11 [0] : vector<8x128xf32> to vector<128xf32>
    %17 = vector.shape_cast %16 : vector<128xf32> to vector<1x128xf32>
    %c0_12 = arith.constant 0 : index
    %c1 = arith.constant 1 : index
    %c0_13 = arith.constant 0 : index
    %18 = vector.load %arg5[%c0_12, %c1, %c0_13] : memref<4x2x128xf32, #tpu.memory_space<vmem>>, vector<1x1x128xf32>
    %19 = vector.shape_cast %18 : vector<1x1x128xf32> to vector<1x128xf32>
    %20 = vector.shape_cast %17 : vector<1x128xf32> to vector<1x1x128xf32>
    tpu.vector_store %arg5[%c0_12, %c1, %c0_13], %20 {strides = array<i32>} : memref<4x2x128xf32, #tpu.memory_space<vmem>>, vector<1x1x128xf32>,
    %21 = arith.truncf %9 : vector<8x128xf32> to vector<8x128xbf16>
    %c1_14 = arith.constant 1 : index
    %c0_15 = arith.constant 0 : index
    %c0_16 = arith.constant 0 : index
    %22 = vector.load %arg2[%c1_14, %c0_15, %c0_16] : memref<4x128x128xbf16, #tpu.memory_space<vmem>>, vector<1x128x128xbf16>
    %23 = vector.shape_cast %22 : vector<1x128x128xbf16> to vector<128x128xbf16>
    %cst_17 = arith.constant dense<0.000000e+00> : vector<8x128xf32>
    %24 = tpu.matmul %21, %23, %cst_17 {dimension_numbers = #tpu.dot_dimension_numbers<[1], [0], [0], [1], [0, 0, 1, 1], [], []>} : vector<8x128xbf16>, vector<128x128xbf16>, vector<8x128xf32> -> vector<8x128xf32>
    %c1_18 = arith.constant 1 : index
    %c0_19 = arith.constant 0 : index
    %25 = vector.load %arg3[%c1_18, %c0_19] : memref<4x128xf32, #tpu.memory_space<vmem>>, vector<1x128xf32>
    %26 = vector.broadcast %25 : vector<1x128xf32> to vector<8x128xf32>
    %27 = arith.addf %24, %26 : vector<8x128xf32>
    %cst_20 = arith.constant 0.000000e+00 : f32
    %28 = vector.broadcast %cst_20 : f32 to vector<8x128xf32>
    %29 = arith.maximumf %27, %28 : vector<8x128xf32>
    %cst_21 = arith.constant dense<0.000000e+00> : vector<128xf32>
    %30 = vector.multi_reduction <add>, %29, %cst_21 [0] : vector<8x128xf32> to vector<128xf32>
    %31 = vector.shape_cast %30 : vector<128xf32> to vector<1x128xf32>
    %c1_22 = arith.constant 1 : index
    %c0_23 = arith.constant 0 : index
    %c0_24 = arith.constant 0 : index
    %32 = vector.load %arg5[%c1_22, %c0_23, %c0_24] : memref<4x2x128xf32, #tpu.memory_space<vmem>>, vector<1x1x128xf32>
    %33 = vector.shape_cast %32 : vector<1x1x128xf32> to vector<1x128xf32>
    %34 = vector.shape_cast %31 : vector<1x128xf32> to vector<1x1x128xf32>
    tpu.vector_store %arg5[%c1_22, %c0_23, %c0_24], %34 {strides = array<i32>} : memref<4x2x128xf32, #tpu.memory_space<vmem>>, vector<1x1x128xf32>,
    %35 = arith.mulf %29, %29 : vector<8x128xf32>
    %cst_25 = arith.constant dense<0.000000e+00> : vector<128xf32>
    %36 = vector.multi_reduction <add>, %35, %cst_25 [0] : vector<8x128xf32> to vector<128xf32>
    %37 = vector.shape_cast %36 : vector<128xf32> to vector<1x128xf32>
    %c1_26 = arith.constant 1 : index
    %c1_27 = arith.constant 1 : index
    %c0_28 = arith.constant 0 : index
    %38 = vector.load %arg5[%c1_26, %c1_27, %c0_28] : memref<4x2x128xf32, #tpu.memory_space<vmem>>, vector<1x1x128xf32>
    %39 = vector.shape_cast %38 : vector<1x1x128xf32> to vector<1x128xf32>
    %40 = vector.shape_cast %37 : vector<1x128xf32> to vector<1x1x128xf32>
    tpu.vector_store %arg5[%c1_26, %c1_27, %c0_28], %40 {strides = array<i32>} : memref<4x2x128xf32, #tpu.memory_space<vmem>>, vector<1x1x128xf32>,
    %41 = arith.truncf %29 : vector<8x128xf32> to vector<8x128xbf16>
    %c2 = arith.constant 2 : index
    %c0_29 = arith.constant 0 : index
    %c0_30 = arith.constant 0 : index
    %42 = vector.load %arg2[%c2, %c0_29, %c0_30] : memref<4x128x128xbf16, #tpu.memory_space<vmem>>, vector<1x128x128xbf16>
    %43 = vector.shape_cast %42 : vector<1x128x128xbf16> to vector<128x128xbf16>
    %cst_31 = arith.constant dense<0.000000e+00> : vector<8x128xf32>
    %44 = tpu.matmul %41, %43, %cst_31 {dimension_numbers = #tpu.dot_dimension_numbers<[1], [0], [0], [1], [0, 0, 1, 1], [], []>} : vector<8x128xbf16>, vector<128x128xbf16>, vector<8x128xf32> -> vector<8x128xf32>
    %c2_32 = arith.constant 2 : index
    %c0_33 = arith.constant 0 : index
    %45 = vector.load %arg3[%c2_32, %c0_33] : memref<4x128xf32, #tpu.memory_space<vmem>>, vector<1x128xf32>
    %46 = vector.broadcast %45 : vector<1x128xf32> to vector<8x128xf32>
    %47 = arith.addf %44, %46 : vector<8x128xf32>
    %cst_34 = arith.constant 0.000000e+00 : f32
    %48 = vector.broadcast %cst_34 : f32 to vector<8x128xf32>
    %49 = arith.maximumf %47, %48 : vector<8x128xf32>
    %cst_35 = arith.constant dense<0.000000e+00> : vector<128xf32>
    %50 = vector.multi_reduction <add>, %49, %cst_35 [0] : vector<8x128xf32> to vector<128xf32>
    %51 = vector.shape_cast %50 : vector<128xf32> to vector<1x128xf32>
    %c2_36 = arith.constant 2 : index
    %c0_37 = arith.constant 0 : index
    %c0_38 = arith.constant 0 : index
    %52 = vector.load %arg5[%c2_36, %c0_37, %c0_38] : memref<4x2x128xf32, #tpu.memory_space<vmem>>, vector<1x1x128xf32>
    %53 = vector.shape_cast %52 : vector<1x1x128xf32> to vector<1x128xf32>
    %54 = vector.shape_cast %51 : vector<1x128xf32> to vector<1x1x128xf32>
    tpu.vector_store %arg5[%c2_36, %c0_37, %c0_38], %54 {strides = array<i32>} : memref<4x2x128xf32, #tpu.memory_space<vmem>>, vector<1x1x128xf32>,
    %55 = arith.mulf %49, %49 : vector<8x128xf32>
    %cst_39 = arith.constant dense<0.000000e+00> : vector<128xf32>
    %56 = vector.multi_reduction <add>, %55, %cst_39 [0] : vector<8x128xf32> to vector<128xf32>
    %57 = vector.shape_cast %56 : vector<128xf32> to vector<1x128xf32>
    %c2_40 = arith.constant 2 : index
    %c1_41 = arith.constant 1 : index
    %c0_42 = arith.constant 0 : index
    %58 = vector.load %arg5[%c2_40, %c1_41, %c0_42] : memref<4x2x128xf32, #tpu.memory_space<vmem>>, vector<1x1x128xf32>
    %59 = vector.shape_cast %58 : vector<1x1x128xf32> to vector<1x128xf32>
    %60 = vector.shape_cast %57 : vector<1x128xf32> to vector<1x1x128xf32>
    tpu.vector_store %arg5[%c2_40, %c1_41, %c0_42], %60 {strides = array<i32>} : memref<4x2x128xf32, #tpu.memory_space<vmem>>, vector<1x1x128xf32>,
    %61 = arith.truncf %49 : vector<8x128xf32> to vector<8x128xbf16>
    %c3 = arith.constant 3 : index
    %c0_43 = arith.constant 0 : index
    %c0_44 = arith.constant 0 : index
    %62 = vector.load %arg2[%c3, %c0_43, %c0_44] : memref<4x128x128xbf16, #tpu.memory_space<vmem>>, vector<1x128x128xbf16>
    %63 = vector.shape_cast %62 : vector<1x128x128xbf16> to vector<128x128xbf16>
    %cst_45 = arith.constant dense<0.000000e+00> : vector<8x128xf32>
    %64 = tpu.matmul %61, %63, %cst_45 {dimension_numbers = #tpu.dot_dimension_numbers<[1], [0], [0], [1], [0, 0, 1, 1], [], []>} : vector<8x128xbf16>, vector<128x128xbf16>, vector<8x128xf32> -> vector<8x128xf32>
    %c3_46 = arith.constant 3 : index
    %c0_47 = arith.constant 0 : index
    %65 = vector.load %arg3[%c3_46, %c0_47] : memref<4x128xf32, #tpu.memory_space<vmem>>, vector<1x128xf32>
    %66 = vector.broadcast %65 : vector<1x128xf32> to vector<8x128xf32>
    %67 = arith.addf %64, %66 : vector<8x128xf32>
    %cst_48 = arith.constant 0.000000e+00 : f32
    %68 = vector.broadcast %cst_48 : f32 to vector<8x128xf32>
    %69 = arith.maximumf %67, %68 : vector<8x128xf32>
    %cst_49 = arith.constant dense<0.000000e+00> : vector<128xf32>
    %70 = vector.multi_reduction <add>, %69, %cst_49 [0] : vector<8x128xf32> to vector<128xf32>
    %71 = vector.shape_cast %70 : vector<128xf32> to vector<1x128xf32>
    %c3_50 = arith.constant 3 : index
    %c0_51 = arith.constant 0 : index
    %c0_52 = arith.constant 0 : index
    %72 = vector.load %arg5[%c3_50, %c0_51, %c0_52] : memref<4x2x128xf32, #tpu.memory_space<vmem>>, vector<1x1x128xf32>
    %73 = vector.shape_cast %72 : vector<1x1x128xf32> to vector<1x128xf32>
    %74 = vector.shape_cast %71 : vector<1x128xf32> to vector<1x1x128xf32>
    tpu.vector_store %arg5[%c3_50, %c0_51, %c0_52], %74 {strides = array<i32>} : memref<4x2x128xf32, #tpu.memory_space<vmem>>, vector<1x1x128xf32>,
    %75 = arith.mulf %69, %69 : vector<8x128xf32>
    %cst_53 = arith.constant dense<0.000000e+00> : vector<128xf32>
    %76 = vector.multi_reduction <add>, %75, %cst_53 [0] : vector<8x128xf32> to vector<128xf32>
    %77 = vector.shape_cast %76 : vector<128xf32> to vector<1x128xf32>
    %c3_54 = arith.constant 3 : index
    %c1_55 = arith.constant 1 : index
    %c0_56 = arith.constant 0 : index
    %78 = vector.load %arg5[%c3_54, %c1_55, %c0_56] : memref<4x2x128xf32, #tpu.memory_space<vmem>>, vector<1x1x128xf32>
    %79 = vector.shape_cast %78 : vector<1x1x128xf32> to vector<1x128xf32>
    %80 = vector.shape_cast %77 : vector<1x128xf32> to vector<1x1x128xf32>
    tpu.vector_store %arg5[%c3_54, %c1_55, %c0_56], %80 {strides = array<i32>} : memref<4x2x128xf32, #tpu.memory_space<vmem>>, vector<1x1x128xf32>,
    %c0_57 = arith.constant 0 : index
    %c0_58 = arith.constant 0 : index
    %81 = vector.load %arg4[%c0_57, %c0_58] : memref<8x128xf32, #tpu.memory_space<vmem>>, vector<8x128xf32>
    tpu.vector_store %arg4[%c0_57, %c0_58], %69 {strides = array<i32>} : memref<8x128xf32, #tpu.memory_space<vmem>>, vector<8x128xf32>,
    return
  }
  func.func @transform_0(%arg0: i32) -> (i32, i32) {
    %c0_i32 = arith.constant 0 : i32
    %c0_i32_0 = arith.constant 0 : i32
    %c0_i32_1 = arith.constant 0 : i32
    return %c0_i32, %c0_i32_0 : i32, i32
  }
  func.func @transform_1(%arg0: i32) -> (i32, i32, i32) {
    %c0_i32 = arith.constant 0 : i32
    %c0_i32_0 = arith.constant 0 : i32
    %c0_i32_1 = arith.constant 0 : i32
    %c0_i32_2 = arith.constant 0 : i32
    return %c0_i32, %c0_i32_0, %c0_i32_1 : i32, i32, i32
  }
  func.func @transform_2(%arg0: i32) -> (i32, i32) {
    %c0_i32 = arith.constant 0 : i32
    %c0_i32_0 = arith.constant 0 : i32
    %c0_i32_1 = arith.constant 0 : i32
    return %c0_i32, %c0_i32_0 : i32, i32
  }
  func.func @transform_3(%arg0: i32) -> (i32, i32) {
    %c0_i32 = arith.constant 0 : i32
    %c0_i32_0 = arith.constant 0 : i32
    %c0_i32_1 = arith.constant 0 : i32
    return %c0_i32, %c0_i32_0 : i32, i32
  }
  func.func @transform_4(%arg0: i32) -> (i32, i32, i32) {
    %c0_i32 = arith.constant 0 : i32
    %c0_i32_0 = arith.constant 0 : i32
    %c0_i32_1 = arith.constant 0 : i32
    %c0_i32_2 = arith.constant 0 : i32
    return %c0_i32, %c0_i32_0, %c0_i32_1 : i32, i32, i32
  }
}

</mosaic_0001>

<bundles_post_ra>
// kernel: fused_mlp_forward.1
= control target key start
LH: loop header
LB: loop body
LE: loop exit
PB: predicated region body
PF: predicated region fallthrough
CT: control target
= control target key end

     0   :  { %10 = vsyncpa [#allocation3], 0  ;;  %s996_s0 = inlined_call_operand.hbm [shape: f32[8,128], index: 0, kind: input, shape index: {}]   ;;  %s997_s1 = inlined_call_operand.hbm [shape: bf16[4,128,128], index: 1, kind: input, shape index: {}]   ;;  %s998_s2 = inlined_call_operand.vmem [shape: f32[4,128], index: 2, kind: input, shape index: {}]   ;;  %s999_s3 = inlined_call_operand.hbm [shape: f32[8,128], index: 3, kind: output, shape index: {0}]   ;;  %s1000_s4 = inlined_call_operand.vmem [shape: f32[4,2,128], index: 4, kind: output, shape index: {1}]  }
   0x1   :  { %11 = vsyncpa [#allocation6], 0 }
   0x2   :  { %12 = vsyncpa [#allocation4], 0  ;;  %s845_s15 = smov [#allocation2]   ;;  %s846_s17 = smov [#allocation5]  }
   0x3   :  { %s19_s16 = sshll.u32 %s845_s15, 4  ;;  %s28_s18 = sshll.u32 %s846_s17, 4  ;;  %s20_s16 = int_to_ptr.vmem [resolvable:$true] %s19_s16  ;;  %s877_s18 = int_to_ptr.vmem [resolvable:$true] %s28_s18 }
   0x4   :  { %s773_s21 = scalar_lea.hbm %s996_s0, 128 }
   0x5   :  { %p774_p0 = scmp.ne.s32.totalorder %s996_s0, %s773_s21  ;;  %p777_p1 = scmp.lt.u32.totalorder %s773_s21, %s996_s0 }
   0x7   :  { %p779_p2 = pnand %p777_p1, %p774_p0 }
   0x9   :  { %782 = shalt.err (!%p779_p2)
}
   0xa   :  { %s783_s26 = scalar_lea.vmem %s20_s16, 128  ;;  %p788_p4 = scmp.lt.s32.totalorder %s20_s16, %s20_s16 }
   0xb   :  { %p784_p3 = scmp.ne.s32.totalorder %s20_s16, %s783_s26  ;;  %p789_p5 = scmp.lt.s32.totalorder %s783_s26, %s783_s26 }
   0xd   :  { %p790_p6 = por %p789_p5, %p788_p4 }
   0xf   :  { %p791_p7 = pnand %p790_p6, %p784_p3 }
  0x11   :  { %794 = shalt.err (!%p791_p7)
}
  0x12   :  { %22 = dma.hbm_to_vmem [thread:$0]  %s996_s0, 128, %s20_s16, [#allocation3]  }
  0x13   :  { %s795_s5 = scalar_lea.hbm %s997_s1, 4096 }
  0x14   :  { %p796_p8 = scmp.ne.s32.totalorder %s997_s1, %s795_s5  ;;  %p799_p9 = scmp.lt.u32.totalorder %s795_s5, %s997_s1 }
  0x16   :  { %p801_p10 = pnand %p799_p9, %p796_p8 }
  0x18   :  { %804 = shalt.err (!%p801_p10)
}
  0x19   :  { %s805_s10 = scalar_lea.vmem %s877_s18, 4096  ;;  %p810_p12 = scmp.lt.s32.totalorder %s877_s18, %s877_s18 }
  0x1a   :  { %p806_p11 = scmp.ne.s32.totalorder %s877_s18, %s805_s10  ;;  %p811_p13 = scmp.lt.s32.totalorder %s805_s10, %s805_s10 }
  0x1c   :  { %p812_p0 = por %p811_p13, %p810_p12 }
  0x1e   :  { %p813_p1 = pnand %p812_p0, %p806_p11 }
  0x20   :  { %816 = shalt.err (!%p813_p1)
}
  0x21   :  { %s847_s0 = smov 64   ;;  %s848_s11 = smov 4  }
  0x22   :  { %34 = dma.hbm_to_vmem [thread:$0]  %s997_s1, 4096, %s877_s18, [#allocation6], %s847_s0, %s847_s0, %s848_s11  }
  0x23   :  { %839 = dma.done.wait [#allocation3], 128  }
  0x24   :  { %840 = vsyncadd [#allocation3], 4294967168 }
  0x25   :  { %841 = dma.done.wait [#allocation6], 4096  }
  0x26   :  { %842 = vsyncadd [#allocation6], 4294963200  ;;  %v849_v0 = vmov 0.0   ;;  %vm850_vm0 = vmmov 0   ;;  %v741_v1 = vld [vmem:[#allocation5] sm:$0xff]   ;;  %v742_v2 = vld [vmem:[#allocation5 + $0x8] sm:$0xff]  }
  0x27   :  { %654 = vmatprep.subr.bf16.mxu0 %v849_v0  ;;  %670 = vmatprep.mubr.msk.bf16.mxu0 %vm850_vm0, %v849_v0  ;;  %v743_v3 = vld [vmem:[#allocation5 + $0x10] sm:$0xff]   ;;  %v749_v4 = vld [vmem:[#allocation5 + $0x40] sm:$0xff]   ;;  %v744_v5 = vld [vmem:[#allocation5 + $0x18] sm:$0xff]   ;;  %s851_s7 = smov [#allocation7]  }
  0x28   :  { %674 = vmatprep.subr.bf16.mxu1 %v849_v0  ;;  %690 = vmatprep.mubr.msk.bf16.mxu1 %vm850_vm0, %v849_v0  ;;  %v750_v6 = vld [vmem:[#allocation5 + $0x48] sm:$0xff]   ;;  %v745_v7 = vld [vmem:[#allocation5 + $0x20] sm:$0xff]   ;;  %v751_v8 = vld [vmem:[#allocation5 + $0x50] sm:$0xff]   ;;  %s562_s8 = sshll.u32 %s851_s7, 4  ;;  %s563_s8 = int_to_ptr.vmem [resolvable:$true] %s562_s8 }
  0x29   :  { %655 = vmatpush3.bf16.msra.mxu0 %v741_v1  ;;  %675 = vmatpush3.bf16.msra.mxu1 %v749_v4  ;;  %v746_v9 = vld [vmem:[#allocation5 + $0x28] sm:$0xff]   ;;  %v752_v10 = vld [vmem:[#allocation5 + $0x58] sm:$0xff]   ;;  %v747_v11 = vld [vmem:[#allocation5 + $0x30] sm:$0xff]   ;;  %s817_s9 = scalar_lea.vmem %s563_s8, 128  ;;  %p822_p3 = scmp.lt.s32.totalorder %s563_s8, %s563_s8 }
  0x2a   :  { %656 = vmatprep.subr.bf16.mxu0 %v849_v0  ;;  %676 = vmatprep.subr.bf16.mxu1 %v849_v0  ;;  %v753_v12 = vld [vmem:[#allocation5 + $0x60] sm:$0xff]   ;;  %v748_v13 = vld [vmem:[#allocation5 + $0x38] sm:$0xff]   ;;  %v754_v15 = vld [vmem:[#allocation5 + $0x68] sm:$0xff]   ;;  %p818_p2 = scmp.ne.s32.totalorder %s563_s8, %s817_s9  ;;  %p823_p4 = scmp.lt.s32.totalorder %s817_s9, %s817_s9 }
  0x2b   :  { %v44_v14 = vld [vmem:[#allocation2] sm:$0xff]  ;;  %v755_v17 = vld [vmem:[#allocation5 + $0x70] sm:$0xff]   ;;  %v757_v19 = vld [vmem:[#allocation5 + $0x80] sm:$0xff]  }
  0x2c   :  { %v45_v16 = vpack.c.bf16 %v44_v14, %v44_v14  ;;  %v756_v18 = vld [vmem:[#allocation5 + $0x78] sm:$0xff]   ;;  %v758_v20 = vld [vmem:[#allocation5 + $0x88] sm:$0xff]   ;;  %v759_v21 = vld [vmem:[#allocation5 + $0x90] sm:$0xff]   ;;  %p824_p5 = por %p823_p4, %p822_p3 }
  0x2d   :  { %657 = vmatpush3.bf16.msra.mxu0 %v742_v2  ;;  %677 = vmatpush3.bf16.msra.mxu1 %v750_v6  ;;  %v760_v22 = vld [vmem:[#allocation5 + $0x98] sm:$0xff]   ;;  %v761_v23 = vld [vmem:[#allocation5 + $0xa0] sm:$0xff]   ;;  %v762_v24 = vld [vmem:[#allocation5 + $0xa8] sm:$0xff]  }
  0x2e   :  { %658 = vmatprep.subr.bf16.mxu0 %v849_v0  ;;  %678 = vmatprep.subr.bf16.mxu1 %v849_v0  ;;  %v576_v25 = vld [vmem:[%s998_s2] ss:$0 sm:$0xff]  ;;  %v763_v46 = vld [vmem:[#allocation5 + $0xb0] sm:$0xff]   ;;  %v765_v48 = vld [vmem:[#allocation5 + $0xc0] sm:$0xff]   ;;  %p825_p6 = pnand %p824_p5, %p818_p2 }
  0x2f   :  { %v764_v47 = vld [vmem:[#allocation5 + $0xb8] sm:$0xff]   ;;  %v766_v49 = vld [vmem:[#allocation5 + $0xc8] sm:$0xff]   ;;  %v767_v50 = vld [vmem:[#allocation5 + $0xd0] sm:$0xff]  }
  0x30   :  { %v768_v51 = vld [vmem:[#allocation5 + $0xd8] sm:$0xff]   ;;  %v769_v52 = vld [vmem:[#allocation5 + $0xe0] sm:$0xff]   ;;  %v770_v53 = vld [vmem:[#allocation5 + $0xe8] sm:$0xff]  }
  0x31   :  { %659 = vmatpush3.bf16.msra.mxu0 %v743_v3  ;;  %679 = vmatpush3.bf16.msra.mxu1 %v751_v8  ;;  %v585_v54 = vld [vmem:[%s998_s2 + $0x1] ss:$0 sm:$0xff]  ;;  %v596_v14 = vld [vmem:[%s998_s2 + $0x2] ss:$0 sm:$0xff] }
  0x32   :  { %660 = vmatprep.subr.bf16.mxu0 %v849_v0  ;;  %680 = vmatprep.subr.bf16.mxu1 %v849_v0 }
  0x35   :  { %661 = vmatpush3.bf16.msra.mxu0 %v744_v5  ;;  %681 = vmatpush3.bf16.msra.mxu1 %v752_v10 }
  0x36   :  { %662 = vmatprep.subr.bf16.mxu0 %v849_v0  ;;  %682 = vmatprep.subr.bf16.mxu1 %v849_v0 }
  0x39   :  { %663 = vmatpush3.bf16.msra.mxu0 %v745_v7  ;;  %683 = vmatpush3.bf16.msra.mxu1 %v753_v12  ;;  %v771_v12 = vld [vmem:[#allocation5 + $0xf0] sm:$0xff]  }
  0x3a   :  { %664 = vmatprep.subr.bf16.mxu0 %v849_v0  ;;  %684 = vmatprep.subr.bf16.mxu1 %v849_v0 }
  0x3d   :  { %665 = vmatpush3.bf16.msra.mxu0 %v746_v9  ;;  %685 = vmatpush3.bf16.msra.mxu1 %v754_v15 }
  0x3e   :  { %666 = vmatprep.subr.bf16.mxu0 %v849_v0  ;;  %686 = vmatprep.subr.bf16.mxu1 %v849_v0 }
  0x41   :  { %667 = vmatpush3.bf16.msra.mxu0 %v747_v11  ;;  %687 = vmatpush3.bf16.msra.mxu1 %v755_v17 }
  0x42   :  { %668 = vmatprep.subr.bf16.mxu0 %v849_v0  ;;  %688 = vmatprep.subr.bf16.mxu1 %v849_v0 }
  0x45   :  { %669 = vmatpush3.bf16.msra.mxu0 %v748_v13  ;;  %689 = vmatpush3.bf16.msra.mxu1 %v756_v18  ;;  %v772_v13 = vld [vmem:[#allocation5 + $0xf8] sm:$0xff]  }
  0x46   :  { %694 = vmatprep.subr.bf16.mxu0 %v849_v0  ;;  %714 = vmatprep.subr.bf16.mxu1 %v849_v0 }
  0x48   :  { %671 = vmatmul.mubr.bf16.vlgmr.msra.gmra.mrb[0].mxu0 %v45_v16 }
  0x49   :  { %710 = vmatprep.mubr.msk.bf16.mxu0 %vm850_vm0, %v849_v0  ;;  %695 = vmatpush3.bf16.msra.mxu0 %v757_v19 }
  0x4a   :  { %696 = vmatprep.subr.bf16.mxu0 %v849_v0 }
  0x4d   :  { %697 = vmatpush3.bf16.msra.mxu0 %v758_v20 }
  0x4e   :  { %698 = vmatprep.subr.bf16.mxu0 %v849_v0 }
  0x51   :  { %699 = vmatpush3.bf16.msra.mxu0 %v759_v21 }
  0x52   :  { %700 = vmatprep.subr.bf16.mxu0 %v849_v0 }
  0x55   :  { %701 = vmatpush3.bf16.msra.mxu0 %v760_v22 }
  0x56   :  { %702 = vmatprep.subr.bf16.mxu0 %v849_v0 }
  0x59   :  { %703 = vmatpush3.bf16.msra.mxu0 %v761_v23 }
  0x5a   :  { %704 = vmatprep.subr.bf16.mxu0 %v849_v0 }
  0x5d   :  { %705 = vmatpush3.bf16.msra.mxu0 %v762_v24 }
  0x5e   :  { %706 = vmatprep.subr.bf16.mxu0 %v849_v0 }
  0x61   :  { %707 = vmatpush3.bf16.msra.mxu0 %v763_v46 }
  0x62   :  { %708 = vmatprep.subr.bf16.mxu0 %v849_v0 }
  0x65   :  { %709 = vmatpush3.bf16.msra.mxu0 %v764_v47 }
 0x11b   :  { %v149_v26 = vpop.f32.mrb[0].mxu0 }
 0x11c   :  { %v150_v27 = vadd.f32 %v576_v25, %v149_v26  ;;  %v672_v28 = vpop.f32.mrb[1].mxu0 }
 0x11d   :  { %v152_v29 = vpop.f32.mrb[2].mxu0 }
 0x11e   :  { %v155_v30 = vmax.f32 %v150_v27, 0.0  ;;  %v673_v31 = vpop.f32.mrb[3].mxu0 }
 0x120   :  { %v156_v32 = vrot.slane %v155_v30, 4  ;;  %v163_v33 = vmul.f32 %v155_v30, %v155_v30  ;;  %v171_v34 = vpack.c.bf16 %v155_v30, %v155_v30 }
 0x122   :  { %v157_v35 = vadd.f32 %v156_v32, %v155_v30  ;;  %v164_v36 = vrot.slane %v163_v33, 4  ;;  %691 = vmatmul.mubr.bf16.vlgmr.msra.gmra.mrb[0].mxu1 %v171_v34  ;;  %v607_v34 = vld [vmem:[%s998_s2 + $0x3] ss:$0 sm:$0xff] }
 0x123   :  { %730 = vmatprep.mubr.msk.bf16.mxu1 %vm850_vm0, %v849_v0  ;;  %715 = vmatpush3.bf16.msra.mxu1 %v765_v48 }
 0x124   :  { %v158_v37 = vrot.slane %v157_v35, 2  ;;  %v165_v38 = vadd.f32 %v164_v36, %v163_v33  ;;  %716 = vmatprep.subr.bf16.mxu1 %v849_v0 }
 0x126   :  { %v159_v39 = vadd.f32 %v158_v37, %v157_v35  ;;  %v166_v40 = vrot.slane %v165_v38, 2 }
 0x127   :  { %717 = vmatpush3.bf16.msra.mxu1 %v766_v49 }
 0x128   :  { %v160_v41 = vrot.slane %v159_v39, 1  ;;  %v167_v42 = vadd.f32 %v166_v40, %v165_v38  ;;  %718 = vmatprep.subr.bf16.mxu1 %v849_v0 }
 0x12a   :  { %v161_v43 = vadd.f32 %v160_v41, %v159_v39  ;;  %v168_v44 = vrot.slane %v167_v42, 1 }
 0x12b   :  { %719 = vmatpush3.bf16.msra.mxu1 %v767_v50 }
 0x12c   :  { %162 = vst [vmem:[%s1000_s4] sm:$0x1] %v161_v43  ;;  %v169_v45 = vadd.f32 %v168_v44, %v167_v42  ;;  %720 = vmatprep.subr.bf16.mxu1 %v849_v0 }
 0x12e   :  { %170 = vst [vmem:[%s1000_s4 + $0x1] sm:$0x1] %v169_v45 }
 0x12f   :  { %721 = vmatpush3.bf16.msra.mxu1 %v768_v51 }
 0x130   :  { %722 = vmatprep.subr.bf16.mxu1 %v849_v0 }
 0x133   :  { %723 = vmatpush3.bf16.msra.mxu1 %v769_v52 }
 0x134   :  { %724 = vmatprep.subr.bf16.mxu1 %v849_v0 }
 0x137   :  { %725 = vmatpush3.bf16.msra.mxu1 %v770_v53 }
 0x138   :  { %726 = vmatprep.subr.bf16.mxu1 %v849_v0 }
 0x13b   :  { %727 = vmatpush3.bf16.msra.mxu1 %v771_v12 }
 0x13c   :  { %728 = vmatprep.subr.bf16.mxu1 %v849_v0 }
 0x13f   :  { %729 = vmatpush3.bf16.msra.mxu1 %v772_v13 }
 0x1f5   :  { %v276_v55 = vpop.f32.mrb[0].mxu1 }
 0x1f6   :  { %v277_v56 = vadd.f32 %v585_v54, %v276_v55  ;;  %v692_v57 = vpop.f32.mrb[1].mxu1 }
 0x1f7   :  { %v279_v58 = vpop.f32.mrb[2].mxu1 }
 0x1f8   :  { %v282_v59 = vmax.f32 %v277_v56, 0.0  ;;  %v693_v60 = vpop.f32.mrb[3].mxu1 }
 0x1fa   :  { %v283_v61 = vrot.slane %v282_v59, 4  ;;  %v291_v62 = vmul.f32 %v282_v59, %v282_v59  ;;  %v299_v63 = vpack.c.bf16 %v282_v59, %v282_v59 }
 0x1fc   :  { %v284_v1 = vadd.f32 %v283_v61, %v282_v59  ;;  %v292_v2 = vrot.slane %v291_v62, 4  ;;  %711 = vmatmul.mubr.bf16.vlgmr.msra.gmra.mrb[4].mxu0 %v299_v63 }
 0x1fe   :  { %v285_v3 = vrot.slane %v284_v1, 2  ;;  %v293_v4 = vadd.f32 %v292_v2, %v291_v62 }
 0x200   :  { %v286_v5 = vadd.f32 %v285_v3, %v284_v1  ;;  %v294_v6 = vrot.slane %v293_v4, 2 }
 0x202   :  { %v287_v7 = vrot.slane %v286_v5, 1  ;;  %v295_v8 = vadd.f32 %v294_v6, %v293_v4 }
 0x204   :  { %v288_v9 = vadd.f32 %v287_v7, %v286_v5  ;;  %v296_v10 = vrot.slane %v295_v8, 1 }
 0x206   :  { %594 = vst [vmem:[%s1000_s4 + $0x2] sm:$0x1] %v288_v9  ;;  %v297_v11 = vadd.f32 %v296_v10, %v295_v8 }
 0x208   :  { %595 = vst [vmem:[%s1000_s4 + $0x3] sm:$0x1] %v297_v11 }
 0x2cf   :  { %v404_v15 = vpop.f32.mrb[4].mxu0 }
 0x2d0   :  { %v405_v16 = vadd.f32 %v596_v14, %v404_v15  ;;  %v712_v17 = vpop.f32.mrb[5].mxu0 }
 0x2d1   :  { %v407_v18 = vpop.f32.mrb[6].mxu0 }
 0x2d2   :  { %v410_v19 = vmax.f32 %v405_v16, 0.0  ;;  %v713_v20 = vpop.f32.mrb[7].mxu0 }
 0x2d4   :  { %v411_v21 = vrot.slane %v410_v19, 4  ;;  %v419_v22 = vmul.f32 %v410_v19, %v410_v19  ;;  %v427_v23 = vpack.c.bf16 %v410_v19, %v410_v19 }
 0x2d6   :  { %v412_v24 = vadd.f32 %v411_v21, %v410_v19  ;;  %v420_v25 = vrot.slane %v419_v22, 4  ;;  %731 = vmatmul.mubr.bf16.vlgmr.msra.gmra.mrb[4].mxu1 %v427_v23 }
 0x2d8   :  { %v413_v26 = vrot.slane %v412_v24, 2  ;;  %v421_v0 = vadd.f32 %v420_v25, %v419_v22 }
 0x2da   :  { %v414_v27 = vadd.f32 %v413_v26, %v412_v24  ;;  %v422_v28 = vrot.slane %v421_v0, 2 }
 0x2dc   :  { %v415_v29 = vrot.slane %v414_v27, 1  ;;  %v423_v30 = vadd.f32 %v422_v28, %v421_v0 }
 0x2de   :  { %v416_v31 = vadd.f32 %v415_v29, %v414_v27  ;;  %v424_v32 = vrot.slane %v423_v30, 1 }
 0x2e0   :  { %605 = vst [vmem:[%s1000_s4 + $0x4] sm:$0x1] %v416_v31  ;;  %v425_v33 = vadd.f32 %v424_v32, %v423_v30 }
 0x2e2   :  { %606 = vst [vmem:[%s1000_s4 + $0x5] sm:$0x1] %v425_v33 }
 0x3a9   :  { %v532_v35 = vpop.f32.mrb[4].mxu1 }
 0x3aa   :  { %v533_v36 = vadd.f32 %v607_v34, %v532_v35  ;;  %v732_v37 = vpop.f32.mrb[5].mxu1 }
 0x3ab   :  { %v535_v38 = vpop.f32.mrb[6].mxu1 }
 0x3ac   :  { %v538_v39 = vmax.f32 %v533_v36, 0.0  ;;  %v733_v40 = vpop.f32.mrb[7].mxu1 }
 0x3ae   :  { %v539_v41 = vrot.slane %v538_v39, 4  ;;  %v547_v42 = vmul.f32 %v538_v39, %v538_v39  ;;  %555 = vst [vmem:[#allocation7] sm:$0xff] %v538_v39 }
 0x3af   :  { %828 = shalt.err (!%p825_p6)
}
 0x3b0   :  { %s829_s0 = scalar_lea.hbm %s999_s3, 128 }
 0x3b1   :  { %p830_p7 = scmp.ne.s32.totalorder %s999_s3, %s829_s0  ;;  %p833_p8 = scmp.lt.u32.totalorder %s829_s0, %s999_s3 }
 0x3b3   :  { %p835_p9 = pnand %p833_p8, %p830_p7 }
 0x3b5   :  { %838 = shalt.err (!%p835_p9)
}
 0x3b6   :  { %565 = dma.vmem_to_hbm [thread:$0]  %s563_s8, 128, %s999_s3, [#allocation4]   ;;  %v540_v43 = vadd.f32 %v539_v41, %v538_v39  ;;  %v548_v44 = vrot.slane %v547_v42, 4 }
 0x3b8   :  { %v541_v45 = vrot.slane %v540_v43, 2  ;;  %v549_v46 = vadd.f32 %v548_v44, %v547_v42 }
 0x3ba   :  { %v542_v47 = vadd.f32 %v541_v45, %v540_v43  ;;  %v550_v48 = vrot.slane %v549_v46, 2 }
 0x3bc   :  { %v543_v49 = vrot.slane %v542_v47, 1  ;;  %v551_v50 = vadd.f32 %v550_v48, %v549_v46 }
 0x3be   :  { %v544_v51 = vadd.f32 %v543_v49, %v542_v47  ;;  %v552_v52 = vrot.slane %v551_v50, 1 }
 0x3c0   :  { %616 = vst [vmem:[%s1000_s4 + $0x6] sm:$0x1] %v544_v51  ;;  %v553_v53 = vadd.f32 %v552_v52, %v551_v50 }
 0x3c2   :  { %617 = vst [vmem:[%s1000_s4 + $0x7] sm:$0x1] %v553_v53 }
 0x3c3   :  { %843 = dma.done.wait [#allocation4], 128  }
 0x3c4   :  { %844 = vsyncadd [#allocation4], 4294967168 }
 0x3c5   :  { %573 = vsyncpa [#allocation3], 1 }
 0x3c6   :  { %574 = vsyncpa [#allocation6], 1 }
 0x3c7   :  { %575 = vsyncpa [#allocation4], 1 }

</bundles_post_ra>
